<compile_context>
chip_gen: v5e
topology: v5e:2x2
jax: 0.10.0
libtpu: 0.0.40
codegen_flags: <defaults>
</compile_context>

<pallas_src>
import jax
import jax.numpy as jnp
from jax.experimental import pallas as pl
from jax.experimental.pallas import tpu as pltpu

BN_EPS = 1e-5
LANE = 128


def _pad_to_lane(n):
    return ((n + LANE - 1) // LANE) * LANE


# ----------------------------------------------------------------------------
# Fused kernel (built per (embedding_dim, generator_dim) configuration)
# ----------------------------------------------------------------------------
def _make_generator_kernel(emb_pad, gpads):
    """Kernel refs: x_pad, (w, gamma, beta) per residual, w_final, b_final,
    out, slab_scratch."""
    n_layers = len(gpads)

    def kernel(*refs):
        x_ref = refs[0]
        res_refs = refs[1:1 + 3 * n_layers]
        wf_ref = refs[1 + 3 * n_layers]
        bf_ref = refs[2 + 3 * n_layers]
        out_ref = refs[3 + 3 * n_layers]
        slab = refs[4 + 3 * n_layers]

        # Stage the lane-padded latent vector at the head of the slab.
        slab[:, 0:emb_pad] = x_ref[...]

        off = emb_pad
        for i in range(n_layers):          # static unroll (few layers)
            w_ref = res_refs[3 * i]
            gamma_ref = res_refs[3 * i + 1]
            beta_ref = res_refs[3 * i + 2]
            dpad = gpads[i]

            # Linear: bf16 operands on the MXU, f32 accumulation.
            # (Residual's fc bias is dropped: it is exactly cancelled by the
            # BatchNorm mean subtraction below.)
            xin = slab[:, 0:off].astype(jnp.bfloat16)
            h = jnp.dot(xin, w_ref[...], preferred_element_type=jnp.float32)

            # BatchNorm1d, training mode (batch mean, biased batch variance),
            # all elementwise math kept in f32 (mandatory on v5e VPU/EUP).
            mean = jnp.mean(h, axis=0, keepdims=True)
            centered = h - mean
            var = jnp.mean(centered * centered, axis=0, keepdims=True)
            inv_std = jax.lax.rsqrt(var + BN_EPS)
            y = jnp.maximum(
                centered * inv_std * gamma_ref[...] + beta_ref[...], 0.0)

            # torch.cat([out, input_], dim=1)  ==  append y into its lane-
            # aligned slab segment (the previous activations stay in place;
            # weight rows were permuted host-side to match this layout).
            slab[:, off:off + dpad] = y
            off += dpad

        # Final Linear over the full slab.
        xin = slab[:, 0:off].astype(jnp.bfloat16)
        out = jnp.dot(xin, wf_ref[...],
                      preferred_element_type=jnp.float32) + bf_ref[...]
        out_ref[...] = out.astype(out_ref.dtype)

    return kernel


# ----------------------------------------------------------------------------
# Parameter init (PyTorch layout / semantics) + host-side packing
# ----------------------------------------------------------------------------
def init_generator_params(key, embedding_dim, generator_dim, data_dim):
    """Params in PyTorch layout: residual i's weight rows are ordered like the
    torch.cat input [y_{i-1}, ..., y_0, x]; weights stored as (in, out)."""
    params = {"residuals": []}
    dim = embedding_dim
    for item in generator_dim:
        key, k_w, k_b, k_g, k_beta = jax.random.split(key, 5)
        bound = 1.0 / (dim ** 0.5)  # PyTorch Linear default init range
        params["residuals"].append({
            "w": jax.random.uniform(k_w, (dim, item), jnp.float32, -bound, bound),
            "b": jax.random.uniform(k_b, (1, item), jnp.float32, -bound, bound),
            "gamma": jnp.ones((1, item), jnp.float32)
                     + 0.01 * jax.random.normal(k_g, (1, item), jnp.float32),
            "beta": 0.01 * jax.random.normal(k_beta, (1, item), jnp.float32),
        })
        dim += item
    key, k_w, k_b = jax.random.split(key, 3)
    bound = 1.0 / (dim ** 0.5)
    params["final"] = {
        "w": jax.random.uniform(k_w, (dim, data_dim), jnp.float32, -bound, bound),
        "b": jax.random.uniform(k_b, (1, data_dim), jnp.float32, -bound, bound),
    }
    return params


def pack_generator_params(params, embedding_dim, generator_dim, data_dim):
    """Pad every feature dim to a multiple of 128 lanes, permute weight rows
    from torch-cat order [y_{i-1},...,y_0,x] to slab order [x,y_0,...,y_{i-1}],
    cast matmul weights to bf16 (f32 accumulation in-kernel)."""
    gdims = list(generator_dim)
    n_layers = len(gdims)
    emb_pad = _pad_to_lane(embedding_dim)
    gpads = [_pad_to_lane(g) for g in gdims]

    # slab-order column offsets of each y segment
    y_off = []
    off = emb_pad
    for gp in gpads:
        y_off.append(off)
        off += gp
    slab_width = off

    packed = {"residuals": []}
    in_pad = emb_pad
    for i in range(n_layers):
        p = params["residuals"][i]
        dout, dpad = gdims[i], gpads[i]
        w_pad = jnp.zeros((in_pad, dpad), jnp.float32)
        r = 0
        for j in range(i - 1, -1, -1):                      # y_{i-1} ... y_0
            w_pad = w_pad.at[y_off[j]:y_off[j] + gdims[j], :dout].set(
                p["w"][r:r + gdims[j], :])
            r += gdims[j]
        w_pad = w_pad.at[0:embedding_dim, :dout].set(       # x
            p["w"][r:r + embedding_dim, :])
        gamma_pad = jnp.zeros((1, dpad), jnp.float32).at[:, :dout].set(p["gamma"])
        beta_pad = jnp.zeros((1, dpad), jnp.float32).at[:, :dout].set(p["beta"])
        # p["b"] intentionally NOT packed (cancelled by BatchNorm mean-sub).
        packed["residuals"].append({
            "w": w_pad.astype(jnp.bfloat16),
            "gamma": gamma_pad,
            "beta": beta_pad,
        })
        in_pad += dpad

    pf = params["final"]
    data_pad = _pad_to_lane(data_dim)
    wf_pad = jnp.zeros((in_pad, data_pad), jnp.float32)
    r = 0
    for j in range(n_layers - 1, -1, -1):
        wf_pad = wf_pad.at[y_off[j]:y_off[j] + gdims[j], :data_dim].set(
            pf["w"][r:r + gdims[j], :])
        r += gdims[j]
    wf_pad = wf_pad.at[0:embedding_dim, :data_dim].set(
        pf["w"][r:r + embedding_dim, :])
    bf_pad = jnp.zeros((1, data_pad), jnp.float32).at[:, :data_dim].set(pf["b"])
    packed["final"] = {"w": wf_pad.astype(jnp.bfloat16), "b": bf_pad}

    packed["meta"] = dict(emb=embedding_dim, emb_pad=emb_pad, gdims=gdims,
                          gpads=gpads, data_dim=data_dim, data_pad=data_pad,
                          slab_width=slab_width)
    return packed


# ----------------------------------------------------------------------------
# Fused forward: one pallas_call for the whole generator
# ----------------------------------------------------------------------------
def generator_forward(packed, x):
    meta = packed["meta"]
    B = x.shape[0]
    emb, emb_pad = meta["emb"], meta["emb_pad"]

    # Lane-pad the latent input once, host-side.
    x_pad = jnp.zeros((B, emb_pad), jnp.float32).at[:, :emb].set(
        x.astype(jnp.float32))

    inputs = [x_pad]
    for p in packed["residuals"]:
        inputs += [p["w"], p["gamma"], p["beta"]]
    inputs += [packed["final"]["w"], packed["final"]["b"]]

    kernel = _make_generator_kernel(emb_pad, meta["gpads"])
    out_pad = pl.pallas_call(
        kernel,
        out_shape=jax.ShapeDtypeStruct((B, meta["data_pad"]), jnp.float32),
        in_specs=[pl.BlockSpec(memory_space=pltpu.MemorySpace.VMEM)] * len(inputs),
        out_specs=pl.BlockSpec(memory_space=pltpu.MemorySpace.VMEM),
        scratch_shapes=[pltpu.VMEM((B, meta["slab_width"]), jnp.float32)],
    )(*inputs)

    # Slice the logical data_dim off the lane-dense padded output (plain JAX).
    return out_pad[:, :meta["data_dim"]]


# ----------------------------------------------------------------------------
# References
# ----------------------------------------------------------------------------
def generator_reference_f32(params, x):
    """Pure-JAX, f32, exact PyTorch semantics (includes residual fc bias)."""
    for p in params["residuals"]:
        h = x @ p["w"] + p["b"]
        mean = jnp.mean(h, axis=0, keepdims=True)
        var = jnp.mean((h - mean) ** 2, axis=0, keepdims=True)
        h = (h - mean) * jax.lax.rsqrt(var + BN_EPS) * p["gamma"] + p["beta"]
        x = jnp.concatenate([jnp.maximum(h, 0.0), x], axis=1)
    return x @ params["final"]["w"] + params["final"]["b"]


def generator_reference_mirror(packed, x):
    """Pure-JAX mirror of the kernel's exact numerics (slab layout, padding,
    bf16 matmul operands, no residual bias) — tight correctness check of the
    Pallas plumbing itself."""
    meta = packed["meta"]
    B = x.shape[0]
    slab = jnp.zeros((B, meta["slab_width"]), jnp.float32)
    slab = slab.at[:, :meta["emb"]].set(x.astype(jnp.float32))
    off = meta["emb_pad"]
    for i, p in enumerate(packed["residuals"]):
        xin = slab[:, :off].astype(jnp.bfloat16)
        h = jnp.dot(xin, p["w"], preferred_element_type=jnp.float32)
        mean = jnp.mean(h, axis=0, keepdims=True)
        c = h - mean
        var = jnp.mean(c * c, axis=0, keepdims=True)
        y = jnp.maximum(c * jax.lax.rsqrt(var + BN_EPS) * p["gamma"] + p["beta"],
                        0.0)
        slab = slab.at[:, off:off + meta["gpads"][i]].set(y)
        off += meta["gpads"][i]
    xin = slab[:, :off].astype(jnp.bfloat16)
    out = jnp.dot(xin, packed["final"]["w"],
                  preferred_element_type=jnp.float32) + packed["final"]["b"]
    return out[:, :meta["data_dim"]]


# ----------------------------------------------------------------------------
if __name__ == "__main__":
    embedding_dim = 32
    generator_dim = (32, 32)
    data_dim = 16
    batch = 8

    key = jax.random.PRNGKey(0)
    key, k_in = jax.random.split(key)
    params = init_generator_params(key, embedding_dim, generator_dim, data_dim)
    packed = pack_generator_params(params, embedding_dim, generator_dim, data_dim)
    x = jax.random.normal(k_in, (batch, embedding_dim), jnp.float32)

    out = jax.block_until_ready(generator_forward(packed, x))

    assert out.shape == (batch, data_dim), out.shape

    # Tight check: Pallas kernel vs pure-JAX mirror of identical numerics.
    mirror = generator_reference_mirror(packed, x)
    assert jnp.allclose(out, mirror, atol=5e-3, rtol=5e-3), \
        float(jnp.max(jnp.abs(out - mirror)))

    # Semantic check vs exact f32 PyTorch-style forward; tolerance reflects
    # bf16 MXU operands (accumulation is f32).
    ref = generator_reference_f32(params, x)
    assert jnp.allclose(out, ref, atol=8e-2, rtol=5e-2), \
        float(jnp.max(jnp.abs(out - ref)))

    print("KERNEL_OK")
</pallas_src>

<mosaic_0001>
module attributes {stable_mosaic.version = 11 : i64} {
  func.func @kernel(%arg0: memref<8x128xf32, #tpu.memory_space<vmem>>, %arg1: memref<128x128xbf16, #tpu.memory_space<vmem>>, %arg2: memref<1x128xf32, #tpu.memory_space<vmem>>, %arg3: memref<1x128xf32, #tpu.memory_space<vmem>>, %arg4: memref<256x128xbf16, #tpu.memory_space<vmem>>, %arg5: memref<1x128xf32, #tpu.memory_space<vmem>>, %arg6: memref<1x128xf32, #tpu.memory_space<vmem>>, %arg7: memref<384x128xbf16, #tpu.memory_space<vmem>>, %arg8: memref<1x128xf32, #tpu.memory_space<vmem>>, %arg9: memref<8x128xf32, #tpu.memory_space<vmem>>, %arg10: memref<8x384xf32, #tpu.memory_space<vmem>>) attributes {dimension_semantics = [], scalar_prefetch = 0 : i64, scratch_operands = 1 : i64, tpu.core_type = #tpu.core_type<tc>} {
    %c0 = arith.constant 0 : index
    %c0_0 = arith.constant 0 : index
    %0 = vector.load %arg0[%c0, %c0_0] : memref<8x128xf32, #tpu.memory_space<vmem>>, vector<8x128xf32>
    %c0_1 = arith.constant 0 : index
    %c0_2 = arith.constant 0 : index
    %1 = vector.load %arg10[%c0_1, %c0_2] : memref<8x384xf32, #tpu.memory_space<vmem>>, vector<8x128xf32>
    tpu.vector_store %arg10[%c0_1, %c0_2], %0 {strides = array<i32>} : memref<8x384xf32, #tpu.memory_space<vmem>>, vector<8x128xf32>,
    %c0_3 = arith.constant 0 : index
    %c0_4 = arith.constant 0 : index
    %2 = vector.load %arg10[%c0_3, %c0_4] : memref<8x384xf32, #tpu.memory_space<vmem>>, vector<8x128xf32>
    %3 = arith.truncf %2 : vector<8x128xf32> to vector<8x128xbf16>
    %c0_5 = arith.constant 0 : index
    %c0_6 = arith.constant 0 : index
    %4 = vector.load %arg1[%c0_5, %c0_6] : memref<128x128xbf16, #tpu.memory_space<vmem>>, vector<128x128xbf16>
    %cst = arith.constant dense<0.000000e+00> : vector<8x128xf32>
    %5 = tpu.matmul %3, %4, %cst {dimension_numbers = #tpu.dot_dimension_numbers<[1], [0], [0], [1], [0, 0, 1, 1], [], []>} : vector<8x128xbf16>, vector<128x128xbf16>, vector<8x128xf32> -> vector<8x128xf32>
    %cst_7 = arith.constant dense<0.000000e+00> : vector<128xf32>
    %6 = vector.multi_reduction <add>, %5, %cst_7 [0] : vector<8x128xf32> to vector<128xf32>
    %7 = vector.shape_cast %6 : vector<128xf32> to vector<1x128xf32>
    %cst_8 = arith.constant 8.000000e+00 : f32
    %8 = vector.broadcast %cst_8 : f32 to vector<1x128xf32>
    %9 = arith.divf %7, %8 : vector<1x128xf32>
    %10 = vector.broadcast %9 : vector<1x128xf32> to vector<8x128xf32>
    %11 = arith.subf %5, %10 : vector<8x128xf32>
    %12 = arith.mulf %11, %11 : vector<8x128xf32>
    %cst_9 = arith.constant dense<0.000000e+00> : vector<128xf32>
    %13 = vector.multi_reduction <add>, %12, %cst_9 [0] : vector<8x128xf32> to vector<128xf32>
    %14 = vector.shape_cast %13 : vector<128xf32> to vector<1x128xf32>
    %cst_10 = arith.constant 8.000000e+00 : f32
    %15 = vector.broadcast %cst_10 : f32 to vector<1x128xf32>
    %16 = arith.divf %14, %15 : vector<1x128xf32>
    %cst_11 = arith.constant 9.99999974E-6 : f32
    %17 = vector.broadcast %cst_11 : f32 to vector<1x128xf32>
    %18 = arith.addf %16, %17 : vector<1x128xf32>
    %19 = math.rsqrt %18 : vector<1x128xf32>
    %20 = vector.broadcast %19 : vector<1x128xf32> to vector<8x128xf32>
    %21 = arith.mulf %11, %20 : vector<8x128xf32>
    %c0_12 = arith.constant 0 : index
    %c0_13 = arith.constant 0 : index
    %22 = vector.load %arg2[%c0_12, %c0_13] : memref<1x128xf32, #tpu.memory_space<vmem>>, vector<1x128xf32>
    %23 = vector.broadcast %22 : vector<1x128xf32> to vector<8x128xf32>
    %24 = arith.mulf %21, %23 : vector<8x128xf32>
    %c0_14 = arith.constant 0 : index
    %c0_15 = arith.constant 0 : index
    %25 = vector.load %arg3[%c0_14, %c0_15] : memref<1x128xf32, #tpu.memory_space<vmem>>, vector<1x128xf32>
    %26 = vector.broadcast %25 : vector<1x128xf32> to vector<8x128xf32>
    %27 = arith.addf %24, %26 : vector<8x128xf32>
    %cst_16 = arith.constant 0.000000e+00 : f32
    %28 = vector.broadcast %cst_16 : f32 to vector<8x128xf32>
    %29 = arith.maximumf %27, %28 : vector<8x128xf32>
    %c0_17 = arith.constant 0 : index
    %c128 = arith.constant 128 : index
    %30 = vector.load %arg10[%c0_17, %c128] : memref<8x384xf32, #tpu.memory_space<vmem>>, vector<8x128xf32>
    tpu.vector_store %arg10[%c0_17, %c128], %29 {strides = array<i32>} : memref<8x384xf32, #tpu.memory_space<vmem>>, vector<8x128xf32>,
    %c0_18 = arith.constant 0 : index
    %c0_19 = arith.constant 0 : index
    %31 = vector.load %arg10[%c0_18, %c0_19] : memref<8x384xf32, #tpu.memory_space<vmem>>, vector<8x256xf32>
    %32 = arith.truncf %31 : vector<8x256xf32> to vector<8x256xbf16>
    %c0_20 = arith.constant 0 : index
    %c0_21 = arith.constant 0 : index
    %33 = vector.load %arg4[%c0_20, %c0_21] : memref<256x128xbf16, #tpu.memory_space<vmem>>, vector<256x128xbf16>
    %cst_22 = arith.constant dense<0.000000e+00> : vector<8x128xf32>
    %34 = tpu.matmul %32, %33, %cst_22 {dimension_numbers = #tpu.dot_dimension_numbers<[1], [0], [0], [1], [0, 0, 1, 1], [], []>} : vector<8x256xbf16>, vector<256x128xbf16>, vector<8x128xf32> -> vector<8x128xf32>
    %cst_23 = arith.constant dense<0.000000e+00> : vector<128xf32>
    %35 = vector.multi_reduction <add>, %34, %cst_23 [0] : vector<8x128xf32> to vector<128xf32>
    %36 = vector.shape_cast %35 : vector<128xf32> to vector<1x128xf32>
    %cst_24 = arith.constant 8.000000e+00 : f32
    %37 = vector.broadcast %cst_24 : f32 to vector<1x128xf32>
    %38 = arith.divf %36, %37 : vector<1x128xf32>
    %39 = vector.broadcast %38 : vector<1x128xf32> to vector<8x128xf32>
    %40 = arith.subf %34, %39 : vector<8x128xf32>
    %41 = arith.mulf %40, %40 : vector<8x128xf32>
    %cst_25 = arith.constant dense<0.000000e+00> : vector<128xf32>
    %42 = vector.multi_reduction <add>, %41, %cst_25 [0] : vector<8x128xf32> to vector<128xf32>
    %43 = vector.shape_cast %42 : vector<128xf32> to vector<1x128xf32>
    %cst_26 = arith.constant 8.000000e+00 : f32
    %44 = vector.broadcast %cst_26 : f32 to vector<1x128xf32>
    %45 = arith.divf %43, %44 : vector<1x128xf32>
    %cst_27 = arith.constant 9.99999974E-6 : f32
    %46 = vector.broadcast %cst_27 : f32 to vector<1x128xf32>
    %47 = arith.addf %45, %46 : vector<1x128xf32>
    %48 = math.rsqrt %47 : vector<1x128xf32>
    %49 = vector.broadcast %48 : vector<1x128xf32> to vector<8x128xf32>
    %50 = arith.mulf %40, %49 : vector<8x128xf32>
    %c0_28 = arith.constant 0 : index
    %c0_29 = arith.constant 0 : index
    %51 = vector.load %arg5[%c0_28, %c0_29] : memref<1x128xf32, #tpu.memory_space<vmem>>, vector<1x128xf32>
    %52 = vector.broadcast %51 : vector<1x128xf32> to vector<8x128xf32>
    %53 = arith.mulf %50, %52 : vector<8x128xf32>
    %c0_30 = arith.constant 0 : index
    %c0_31 = arith.constant 0 : index
    %54 = vector.load %arg6[%c0_30, %c0_31] : memref<1x128xf32, #tpu.memory_space<vmem>>, vector<1x128xf32>
    %55 = vector.broadcast %54 : vector<1x128xf32> to vector<8x128xf32>
    %56 = arith.addf %53, %55 : vector<8x128xf32>
    %cst_32 = arith.constant 0.000000e+00 : f32
    %57 = vector.broadcast %cst_32 : f32 to vector<8x128xf32>
    %58 = arith.maximumf %56, %57 : vector<8x128xf32>
    %c0_33 = arith.constant 0 : index
    %c256 = arith.constant 256 : index
    %59 = vector.load %arg10[%c0_33, %c256] : memref<8x384xf32, #tpu.memory_space<vmem>>, vector<8x128xf32>
    tpu.vector_store %arg10[%c0_33, %c256], %58 {strides = array<i32>} : memref<8x384xf32, #tpu.memory_space<vmem>>, vector<8x128xf32>,
    %c0_34 = arith.constant 0 : index
    %c0_35 = arith.constant 0 : index
    %60 = vector.load %arg10[%c0_34, %c0_35] : memref<8x384xf32, #tpu.memory_space<vmem>>, vector<8x384xf32>
    %61 = arith.truncf %60 : vector<8x384xf32> to vector<8x384xbf16>
    %c0_36 = arith.constant 0 : index
    %c0_37 = arith.constant 0 : index
    %62 = vector.load %arg7[%c0_36, %c0_37] : memref<384x128xbf16, #tpu.memory_space<vmem>>, vector<384x128xbf16>
    %cst_38 = arith.constant dense<0.000000e+00> : vector<8x128xf32>
    %63 = tpu.matmul %61, %62, %cst_38 {dimension_numbers = #tpu.dot_dimension_numbers<[1], [0], [0], [1], [0, 0, 1, 1], [], []>} : vector<8x384xbf16>, vector<384x128xbf16>, vector<8x128xf32> -> vector<8x128xf32>
    %c0_39 = arith.constant 0 : index
    %c0_40 = arith.constant 0 : index
    %64 = vector.load %arg8[%c0_39, %c0_40] : memref<1x128xf32, #tpu.memory_space<vmem>>, vector<1x128xf32>
    %65 = vector.broadcast %64 : vector<1x128xf32> to vector<8x128xf32>
    %66 = arith.addf %63, %65 : vector<8x128xf32>
    %c0_41 = arith.constant 0 : index
    %c0_42 = arith.constant 0 : index
    %67 = vector.load %arg9[%c0_41, %c0_42] : memref<8x128xf32, #tpu.memory_space<vmem>>, vector<8x128xf32>
    tpu.vector_store %arg9[%c0_41, %c0_42], %66 {strides = array<i32>} : memref<8x128xf32, #tpu.memory_space<vmem>>, vector<8x128xf32>,
    return
  }
}

</mosaic_0001>

<bundles_post_ra>
// kernel: tpu_custom_call.1
= control target key start
LH: loop header
LB: loop body
LE: loop exit
PB: predicated region body
PF: predicated region fallthrough
CT: control target
= control target key end

     0   :  { %14 = vsyncpa [#allocation4], 0  ;;  %s1167_s0 = inlined_call_operand.hbm [shape: f32[8,128], index: 0, kind: input, shape index: {}]   ;;  %s1168_s1 = inlined_call_operand.hbm [shape: bf16[128,128], index: 1, kind: input, shape index: {}]   ;;  %s1169_s2 = inlined_call_operand.vmem [shape: f32[1,128], index: 2, kind: input, shape index: {}]   ;;  %s1170_s3 = inlined_call_operand.vmem [shape: f32[1,128], index: 3, kind: input, shape index: {}]   ;;  %s1171_s4 = inlined_call_operand.hbm [shape: bf16[256,128], index: 4, kind: input, shape index: {}]   ;;  %s1172_s5 = inlined_call_operand.vmem [shape: f32[1,128], index: 5, kind: input, shape index: {}]   ;;  %s1173_s6 = inlined_call_operand.vmem [shape: f32[1,128], index: 6, kind: input, shape index: {}]   ;;  %s1174_s7 = inlined_call_operand.hbm [shape: bf16[384,128], index: 7, kind: input, shape index: {}]   ;;  %s1175_s8 = inlined_call_operand.vmem [shape: f32[1,128], index: 8, kind: input, shape index: {}]   ;;  %s1176_s9 = inlined_call_operand.hbm [shape: f32[8,128], index: 9, kind: output, shape index: {}]  }
   0x1   :  { %15 = vsyncpa [#allocation7], 0 }
   0x2   :  { %16 = vsyncpa [#allocation10], 0  ;;  %s33_s11 = sshll.u32 %s1168_s1, 4  ;;  %s34_s11 = int_to_ptr.hbm [resolvable:$true] %s33_s11 }
   0x3   :  { %17 = vsyncpa [#allocation5], 0  ;;  %s1068_s12 = smov [#allocation6]   ;;  %s23_s16 = sshll.u32 %s1167_s0, 4  ;;  %s24_s16 = int_to_ptr.hbm [resolvable:$true] %s23_s16 }
   0x4   :  { %s35_s13 = sshll.u32 %s1068_s12, 4  ;;  %s1069_s17 = smov 64   ;;  %s36_s13 = int_to_ptr.vmem [resolvable:$true] %s35_s13 }
   0x5   :  { %s1070_s18 = smov 4   ;;  %s1071_s19 = smov [#allocation3]  }
   0x6   :  { %41 = dma.hbm_to_vmem [thread:$0]  %s34_s11, 1024, %s36_s13, [#allocation7], %s1069_s17, %s1069_s17, %s1070_s18  }
   0x7   :  { %s25_s20 = sshll.u32 %s1071_s19, 4  ;;  %s50_s23 = sshll.u32 %s1171_s4, 4  ;;  %s26_s20 = int_to_ptr.vmem [resolvable:$true] %s25_s20  ;;  %s51_s23 = int_to_ptr.hbm [resolvable:$true] %s50_s23 }
   0x8   :  { %28 = dma.hbm_to_vmem [thread:$0]  %s24_s16, 128, %s26_s20, [#allocation4]  }
   0x9   :  { %s67_s25 = sshll.u32 %s1174_s7, 4  ;;  %s1072_s26 = smov [#allocation8]   ;;  %s68_s25 = int_to_ptr.hbm [resolvable:$true] %s67_s25 }
   0xa   :  { %s52_s27 = sshll.u32 %s1072_s26, 4  ;;  %s1073_s0 = smov [#allocation9]   ;;  %s53_s27 = int_to_ptr.vmem [resolvable:$true] %s52_s27 }
   0xb   :  { %58 = dma.hbm_to_vmem [thread:$0]  %s51_s23, 2048, %s53_s27, [#allocation7], %s1069_s17, %s1069_s17, %s1070_s18  }
   0xc   :  { %s69_s28 = sshll.u32 %s1073_s0, 4  ;;  %s70_s28 = int_to_ptr.vmem [resolvable:$true] %s69_s28 }
   0xd   :  { %75 = dma.hbm_to_vmem [thread:$0]  %s68_s25, 3072, %s70_s28, [#allocation10], %s1069_s17, %s1069_s17, %s1070_s18  }
   0xe   :  { %1060 = dma.done.wait [#allocation4], 128  }
   0xf   :  { %1061 = vsyncadd [#allocation4], 4294967168 }
  0x10   :  { %1062 = dma.done.wait [#allocation7], 3072  }
  0x11   :  { %1063 = vsyncadd [#allocation7], 4294964224 }
  0x12   :  { %1064 = dma.done.wait [#allocation10], 3072  }
  0x13   :  { %1065 = vsyncadd [#allocation10], 4294964224  ;;  %v880_v0 = vld [vmem:[#allocation6 + $0x38] sm:$0xff]  ;;  %v879_v1 = vld [vmem:[#allocation6 + $0x30] sm:$0xff]  ;;  %v1074_v10 = vmov 8.0   ;;  %s1075_s13 = smov [#allocation11]  }
  0x14   :  { %162 = vmatpush.bf16.msra.mxu0 %v880_v0  ;;  %v878_v2 = vld [vmem:[#allocation6 + $0x28] sm:$0xff]  ;;  %v877_v3 = vld [vmem:[#allocation6 + $0x20] sm:$0xff]  ;;  %v876_v4 = vld [vmem:[#allocation6 + $0x18] sm:$0xff]  ;;  %934 = vrcp.f32 %v1074_v10  ;;  %s667_s14 = sshll.u32 %s1075_s13, 4  ;;  %s669_s17 = sshll.u32 %s1176_s9, 4  ;;  %s668_s14 = int_to_ptr.vmem [resolvable:$true] %s667_s14  ;;  %s670_s17 = int_to_ptr.hbm [resolvable:$true] %s669_s17 }
  0x15   :  { %v875_v5 = vld [vmem:[#allocation6 + $0x10] sm:$0xff]  ;;  %v874_v6 = vld [vmem:[#allocation6 + $0x8] sm:$0xff]  ;;  %v873_v7 = vld [vmem:[#allocation6] sm:$0xff] }
  0x16   :  { %v94_v8 = vld [vmem:[#allocation3] sm:$0xff]  ;;  %v903_v14 = vld [vmem:[#allocation9 + $0x30] sm:$0xff]  ;;  %v902_v18 = vld [vmem:[#allocation9 + $0x28] sm:$0xff] }
  0x17   :  { %v1138_v9 = vpack.c.bf16 %v94_v8, %v94_v8  ;;  %v904_v11 = vld [vmem:[#allocation9 + $0x38] sm:$0xff]  ;;  %v887_v21 = vld [vmem:[#allocation8 + $0x30] sm:$0xff]  ;;  %v901_v25 = vld [vmem:[#allocation9 + $0x20] sm:$0xff] }
  0x18   :  { %163 = vmatpush.bf16.msra.mxu0 %v879_v1  ;;  %622 = vmatpush.bf16.msra.mxu3 %v904_v11  ;;  %v888_v15 = vld [vmem:[#allocation8 + $0x38] sm:$0xff]  ;;  %v895_v24 = vld [vmem:[#allocation8 + $0x70] sm:$0xff]  ;;  %v886_v28 = vld [vmem:[#allocation8 + $0x28] sm:$0xff] }
  0x19   :  { %354 = vmatpush.bf16.msra.mxu1 %v888_v15  ;;  %v896_v17 = vld [vmem:[#allocation8 + $0x78] sm:$0xff]  ;;  %v911_v26 = vld [vmem:[#allocation9 + $0x70] sm:$0xff]  ;;  %v894_v31 = vld [vmem:[#allocation8 + $0x68] sm:$0xff] }
  0x1a   :  { %v935_v12 = vpop.eup %934  ;;  %v912_v19 = vld [vmem:[#allocation9 + $0x78] sm:$0xff]  ;;  %367 = vmatpush.bf16.msra.mxu2 %v896_v17  ;;  %v910_v33 = vld [vmem:[#allocation9 + $0x68] sm:$0xff]  ;;  %v885_v36 = vld [vmem:[#allocation8 + $0x20] sm:$0xff] }
  0x1b   :  { %v182_v13 = vmul.f32 8.0, %v935_v12  ;;  %v900_v32 = vld [vmem:[#allocation9 + $0x18] sm:$0xff]  ;;  %vm186_vm0 = vweird.f32 %v935_v12  ;;  %v893_v39 = vld [vmem:[#allocation8 + $0x60] sm:$0xff]  ;;  %v899_v40 = vld [vmem:[#allocation9 + $0x10] sm:$0xff] }
  0x1c   :  { %164 = vmatpush.bf16.msra.mxu0 %v878_v2  ;;  %623 = vmatpush.bf16.msra.mxu3 %v903_v14  ;;  %v909_v41 = vld [vmem:[#allocation9 + $0x60] sm:$0xff]  ;;  %v884_v43 = vld [vmem:[#allocation8 + $0x18] sm:$0xff]  ;;  %v898_v46 = vld [vmem:[#allocation9 + $0x8] sm:$0xff] }
  0x1d   :  { %v183_v16 = vsub.f32 1.0, %v182_v13  ;;  %355 = vmatpush.bf16.msra.mxu1 %v887_v21  ;;  %v892_v45 = vld [vmem:[#allocation8 + $0x58] sm:$0xff]  ;;  %v883_v49 = vld [vmem:[#allocation8 + $0x10] sm:$0xff]  ;;  %v897_v52 = vld [vmem:[#allocation9] sm:$0xff] }
  0x1e   :  { %368 = vmatpush.bf16.msra.mxu2 %v895_v24  ;;  %v908_v47 = vld [vmem:[#allocation9 + $0x58] sm:$0xff]  ;;  %v891_v51 = vld [vmem:[#allocation8 + $0x50] sm:$0xff]  ;;  %v882_v55 = vld [vmem:[#allocation8 + $0x8] sm:$0xff] }
  0x1f   :  { %v184_v23 = vmul.f32 %v935_v12, %v183_v16  ;;  %v907_v53 = vld [vmem:[#allocation9 + $0x50] sm:$0xff]  ;;  %v890_v57 = vld [vmem:[#allocation8 + $0x48] sm:$0xff]  ;;  %v881_v59 = vld [vmem:[#allocation8] sm:$0xff] }
  0x20   :  { %165 = vmatpush.bf16.msra.mxu0 %v877_v3  ;;  %624 = vmatpush.bf16.msra.mxu3 %v902_v18  ;;  %v906_v58 = vld [vmem:[#allocation9 + $0x48] sm:$0xff]  ;;  %v889_v61 = vld [vmem:[#allocation8 + $0x40] sm:$0xff]  ;;  %v929_v11 = vld [vmem:[%s1169_s2] ss:$0 sm:$0xff] }
  0x21   :  { %v185_v30 = vadd.f32 %v935_v12, %v184_v23  ;;  %356 = vmatpush.bf16.msra.mxu1 %v886_v28  ;;  %v905_v63 = vld [vmem:[#allocation9 + $0x40] sm:$0xff] }
  0x22   :  { %369 = vmatpush.bf16.msra.mxu2 %v894_v31  ;;  %v919_v31 = vld [vmem:[#allocation9 + $0xb0] sm:$0xff] }
  0x23   :  { %v1141_v38 = vsel %vm186_vm0, %v935_v12, %v185_v30 }
  0x24   :  { %166 = vmatpush.bf16.msra.mxu0 %v876_v4  ;;  %625 = vmatpush.bf16.msra.mxu3 %v901_v25 }
  0x25   :  { %357 = vmatpush.bf16.msra.mxu1 %v885_v36 }
  0x26   :  { %370 = vmatpush.bf16.msra.mxu2 %v893_v39  ;;  %v917_v39 = vld [vmem:[#allocation9 + $0xa0] sm:$0xff] }
  0x28   :  { %167 = vmatpush.bf16.msra.mxu0 %v875_v5  ;;  %626 = vmatpush.bf16.msra.mxu3 %v900_v32 }
  0x29   :  { %358 = vmatpush.bf16.msra.mxu1 %v884_v43 }
  0x2a   :  { %371 = vmatpush.bf16.msra.mxu2 %v892_v45  ;;  %v915_v45 = vld [vmem:[#allocation9 + $0x90] sm:$0xff] }
  0x2c   :  { %168 = vmatpush.bf16.msra.mxu0 %v874_v6  ;;  %627 = vmatpush.bf16.msra.mxu3 %v899_v40 }
  0x2d   :  { %359 = vmatpush.bf16.msra.mxu1 %v883_v49 }
  0x2e   :  { %372 = vmatpush.bf16.msra.mxu2 %v891_v51 }
  0x30   :  { %169 = vmatpush.bf16.msra.mxu0 %v873_v7  ;;  %628 = vmatpush.bf16.msra.mxu3 %v898_v46 }
  0x31   :  { %360 = vmatpush.bf16.msra.mxu1 %v882_v55 }
  0x32   :  { %373 = vmatpush.bf16.msra.mxu2 %v890_v57 }
  0x33   :  { %170 = vmatmul.bf16.vlgmr.msra.gmra.mxu0 %v1138_v9 }
  0x34   :  { %635 = vmatpush.bf16.msrb.mxu0 %v912_v19  ;;  %629 = vmatpush.bf16.msra.mxu3 %v897_v52 }
  0x35   :  { %361 = vmatpush.bf16.msra.mxu1 %v881_v59 }
  0x36   :  { %374 = vmatpush.bf16.msra.mxu2 %v889_v61 }
  0x37   :  { %630 = vmatmul.bf16.vlgmr.msra.gmra.mxu3 %v1138_v9 }
  0x38   :  { %636 = vmatpush.bf16.msrb.mxu0 %v911_v26  ;;  %362 = vmatmul.bf16.vlgmr.msra.gmra.mxu1 %v1138_v9  ;;  %v930_v9 = vld [vmem:[%s1170_s3] ss:$0 sm:$0xff] }
  0x3c   :  { %637 = vmatpush.bf16.msrb.mxu0 %v910_v33 }
  0x40   :  { %638 = vmatpush.bf16.msrb.mxu0 %v909_v41 }
  0x44   :  { %639 = vmatpush.bf16.msrb.mxu0 %v908_v47 }
  0x48   :  { %640 = vmatpush.bf16.msrb.mxu0 %v907_v53 }
  0x4c   :  { %641 = vmatpush.bf16.msrb.mxu0 %v906_v58 }
  0x50   :  { %642 = vmatpush.bf16.msrb.mxu0 %v905_v63 }
  0xb0   :  { %v171_v20 = vpop.f32.mrf.mxu0 }
  0xb1   :  { %v175_v22 = vrot.slane %v171_v20, 4 }
  0xb3   :  { %v176_v27 = vadd.f32 %v175_v22, %v171_v20  ;;  %v931_v22 = vld [vmem:[%s1175_s8] ss:$0 sm:$0xff] }
  0xb5   :  { %v177_v29 = vrot.slane %v176_v27, 2  ;;  %v363_v18 = vpop.f32.mrf.mxu1 }
  0xb7   :  { %v178_v34 = vadd.f32 %v177_v29, %v176_v27  ;;  %v920_v27 = vld [vmem:[#allocation9 + $0xb8] sm:$0xff] }
  0xb8   :  { %v173_v35 = vpop.f32.mrf.mxu0  ;;  %648 = vmatpush.bf16.msrb.mxu1 %v920_v27 }
  0xb9   :  { %v179_v37 = vrot.slane %v178_v34, 1  ;;  %v918_v35 = vld [vmem:[#allocation9 + $0xa8] sm:$0xff] }
  0xba   :  { %v631_v19 = vpop.f32.mrf.mxu3 }
  0xbb   :  { %v180_v42 = vadd.f32 %v179_v37, %v178_v34  ;;  %v632_v23 = vadd.f32 %v931_v22, %v631_v19 }
  0xbc   :  { %649 = vmatpush.bf16.msrb.mxu1 %v919_v31 }
  0xbd   :  { %v188_v44 = vmul.f32 %v1141_v38, %v180_v42  ;;  %v916_v42 = vld [vmem:[#allocation9 + $0x98] sm:$0xff] }
  0xbf   :  { %v189_v48 = vsub.f32 %v171_v20, %v188_v44  ;;  %v365_v20 = vpop.f32.mrf.mxu1 }
  0xc0   :  { %650 = vmatpush.bf16.msrb.mxu1 %v918_v35 }
  0xc1   :  { %v190_v50 = vmul.f32 %v189_v48, %v189_v48 }
  0xc2   :  { %v633_v21 = vpop.f32.mrf.mxu3 }
  0xc3   :  { %v191_v54 = vrot.slane %v190_v50, 4 }
  0xc4   :  { %651 = vmatpush.bf16.msrb.mxu1 %v917_v39 }
  0xc5   :  { %v192_v56 = vadd.f32 %v191_v54, %v190_v50  ;;  %v913_v50 = vld [vmem:[#allocation9 + $0x80] sm:$0xff] }
  0xc7   :  { %v193_v60 = vrot.slane %v192_v56, 2 }
  0xc8   :  { %652 = vmatpush.bf16.msrb.mxu1 %v916_v42 }
  0xc9   :  { %v194_v62 = vadd.f32 %v193_v60, %v192_v56 }
  0xcb   :  { %v195_v0 = vrot.slane %v194_v62, 1 }
  0xcc   :  { %653 = vmatpush.bf16.msrb.mxu1 %v915_v45 }
  0xcd   :  { %v196_v1 = vadd.f32 %v195_v0, %v194_v62  ;;  %v932_v62 = vld [vmem:[%s1172_s5] ss:$0 sm:$0xff] }
  0xcf   :  { %v197_v2 = vmul.f32 %v196_v1, %v1141_v38 }
  0xd1   :  { %v198_v3 = vadd.f32 1e-05, %v197_v2 }
  0xd3   :  { %936 = vrsqrt.f32 %v198_v3  ;;  %vm205_vm2 = vweird.f32 %v198_v3 }
  0xd9   :  { %v937_v4 = vpop.eup %936 }
  0xda   :  { %v200_v5 = vmul.f32 %v937_v4, %v198_v3  ;;  %vm206_vm1 = vweird.f32 %v937_v4 }
  0xdb   :  { %vm207_vm3 = vmor %vm205_vm2, %vm206_vm1 }
  0xdc   :  { %v201_v6 = vmul.f32 %v937_v4, %v200_v5 }
  0xde   :  { %v202_v7 = vmul.f32 0.5, %v201_v6 }
  0xe0   :  { %v203_v8 = vsub.f32 1.5, %v202_v7 }
  0xe2   :  { %v204_v10 = vmul.f32 %v937_v4, %v203_v8 }
  0xe4   :  { %v208_v12 = vsel %vm207_vm3, %v937_v4, %v204_v10 }
  0xe5   :  { %v209_v13 = vmul.f32 %v208_v12, %v189_v48  ;;  %v914_v48 = vld [vmem:[#allocation9 + $0x88] sm:$0xff] }
  0xe6   :  { %654 = vmatpush.bf16.msrb.mxu1 %v914_v48 }
  0xe7   :  { %v214_v14 = vmul.f32 %v929_v11, %v209_v13 }
  0xe9   :  { %v219_v15 = vadd.f32 %v930_v9, %v214_v14 }
  0xea   :  { %655 = vmatpush.bf16.msrb.mxu1 %v913_v50 }
  0xeb   :  { %v220_v16 = vmax.f32 %v219_v15, 0.0 }
  0xed   :  { %v225_v17 = vpack.c.bf16 %v220_v16, %v220_v16 }
  0xef   :  { %375 = vmatmul.bf16.vlgmr.msra.gmra.mxu2 %v225_v17  ;;  %643 = vmatmul.bf16.vlgmr.msrb.gmra.mxu0 %v225_v17 }
 0x16c   :  { %v644_v24 = vpop.f32.mrf.mxu0 }
 0x16d   :  { %v645_v25 = vadd.f32 %v644_v24, %v632_v23 }
 0x172   :  { %v376_v26 = vpop.f32.mrf.mxu2 }
 0x173   :  { %v377_v28 = vadd.f32 %v376_v26, %v363_v18 }
 0x174   :  { %v646_v29 = vpop.f32.mrf.mxu0 }
 0x175   :  { %v380_v30 = vrot.slane %v377_v28, 4 }
 0x177   :  { %v381_v32 = vadd.f32 %v380_v30, %v377_v28 }
 0x179   :  { %v382_v33 = vrot.slane %v381_v32, 2 }
 0x17a   :  { %v378_v34 = vpop.f32.mrf.mxu2 }
 0x17b   :  { %v383_v36 = vadd.f32 %v382_v33, %v381_v32 }
 0x17d   :  { %v384_v37 = vrot.slane %v383_v36, 1 }
 0x17f   :  { %v385_v40 = vadd.f32 %v384_v37, %v383_v36 }
 0x181   :  { %v386_v41 = vmul.f32 %v385_v40, %v1141_v38 }
 0x183   :  { %v387_v43 = vsub.f32 %v377_v28, %v386_v41 }
 0x185   :  { %v388_v44 = vmul.f32 %v387_v43, %v387_v43 }
 0x187   :  { %v389_v46 = vrot.slane %v388_v44, 4 }
 0x189   :  { %v390_v47 = vadd.f32 %v389_v46, %v388_v44 }
 0x18b   :  { %v391_v49 = vrot.slane %v390_v47, 2 }
 0x18d   :  { %v392_v51 = vadd.f32 %v391_v49, %v390_v47 }
 0x18f   :  { %v393_v52 = vrot.slane %v392_v51, 1 }
 0x191   :  { %v394_v53 = vadd.f32 %v393_v52, %v392_v51 }
 0x193   :  { %v395_v54 = vmul.f32 %v394_v53, %v1141_v38  ;;  %v933_v38 = vld [vmem:[%s1173_s6] ss:$0 sm:$0xff] }
 0x195   :  { %v396_v55 = vadd.f32 1e-05, %v395_v54 }
 0x197   :  { %938 = vrsqrt.f32 %v396_v55  ;;  %vm403_vm5 = vweird.f32 %v396_v55 }
 0x19d   :  { %v939_v56 = vpop.eup %938 }
 0x19e   :  { %v398_v57 = vmul.f32 %v939_v56, %v396_v55  ;;  %vm404_vm4 = vweird.f32 %v939_v56 }
 0x19f   :  { %vm405_vm6 = vmor %vm403_vm5, %vm404_vm4 }
 0x1a0   :  { %v399_v58 = vmul.f32 %v939_v56, %v398_v57 }
 0x1a2   :  { %v400_v59 = vmul.f32 0.5, %v399_v58 }
 0x1a4   :  { %v401_v60 = vsub.f32 1.5, %v400_v59 }
 0x1a6   :  { %v402_v61 = vmul.f32 %v939_v56, %v401_v60 }
 0x1a8   :  { %v406_v63 = vsel %vm405_vm6, %v939_v56, %v402_v61 }
 0x1a9   :  { %v407_v0 = vmul.f32 %v406_v63, %v387_v43 }
 0x1ab   :  { %v412_v1 = vmul.f32 %v932_v62, %v407_v0 }
 0x1ad   :  { %v417_v2 = vadd.f32 %v933_v38, %v412_v1 }
 0x1af   :  { %v418_v3 = vmax.f32 %v417_v2, 0.0 }
 0x1b1   :  { %v425_v4 = vpack.c.bf16 %v418_v3, %v418_v3 }
 0x1b3   :  { %656 = vmatmul.bf16.vlgmr.msrb.gmra.mxu1 %v425_v4 }
 0x230   :  { %v657_v5 = vpop.f32.mrf.mxu1 }
 0x231   :  { %v658_v6 = vadd.f32 %v657_v5, %v645_v25 }
 0x233   :  { %661 = vst [vmem:[#allocation11] sm:$0xff] %v658_v6 }
 0x234   :  { %672 = dma.vmem_to_hbm [thread:$0]  %s668_s14, 128, %s670_s17, [#allocation5]  }
 0x238   :  { %v659_v7 = vpop.f32.mrf.mxu1 }
 0x239   :  { %1066 = dma.done.wait [#allocation5], 128  }
 0x23a   :  { %1067 = vsyncadd [#allocation5], 4294967168 }
 0x23b   :  { %677 = vsyncpa [#allocation4], 1 }
 0x23c   :  { %678 = vsyncpa [#allocation7], 1 }
 0x23d   :  { %679 = vsyncpa [#allocation10], 1 }
 0x23e   :  { %680 = vsyncpa [#allocation5], 1 }

</bundles_post_ra>
